<compile_context>
chip_gen: v7x
topology: tpu7x:2x2x1
jax: 0.10.0
libtpu: 0.0.40
codegen_flags: <defaults>
</compile_context>

<pallas_src>
import math

import jax
import jax.numpy as jnp
from jax.experimental import pallas as pl
from jax.experimental.pallas import tpu as pltpu


def _feature_regression_kernel(x_ref, w_ref, db_ref, o_ref):
    """One batch tile: x @ W.T - x*diag(W) + b, with f32 accumulation."""
    x = x_ref[...]                                    # (TB, D)
    # Contract on W's in_features axis (axis 1) directly -- no transpose.
    acc = jax.lax.dot_general(
        x, w_ref[...],
        dimension_numbers=(((1,), (1,)), ((), ())),
        preferred_element_type=jnp.float32)           # (TB, D) f32
    diag_w = db_ref[0:1, :]                           # (1, D) f32
    bias = db_ref[1:2, :]                             # (1, D) f32
    # Remove the diagonal contribution:  sum_k x_k W[j,k]  ->  sum_{k!=j}.
    acc = acc - x.astype(jnp.float32) * diag_w + bias
    o_ref[...] = acc.astype(o_ref.dtype)


def feature_regression(x, W, b, *, batch_tile=None):
    """x: (B, D); W: (D, D) (out_features, in_features); b: (D,)."""
    B, D = x.shape

    # diag(W) and bias kept in float32 (precision path of the f32 accumulator),
    # packed into one small resident tensor: row 0 = diag(W), row 1 = b.
    diag_b = jnp.stack(
        [jnp.diagonal(W).astype(jnp.float32), b.astype(jnp.float32)], axis=0)

    # Batch tile: multiple of 8 sublanes.  Small batches -> single tile (no
    # grid-step overhead); large batches -> big tile to amortize per-step cost.
    if batch_tile is None:
        batch_tile = 2048 if B >= 2048 else max(8, ((B + 7) // 8) * 8)
    TB = batch_tile
    num_tiles = pl.cdiv(B, TB)
    Bp = num_tiles * TB
    xp = x if Bp == B else jnp.pad(x, ((0, Bp - B), (0, 0)))

    out = pl.pallas_call(
        _feature_regression_kernel,
        out_shape=jax.ShapeDtypeStruct((Bp, D), x.dtype),
        grid=(num_tiles,),
        in_specs=[
            pl.BlockSpec((TB, D), lambda i: (i, 0)),   # x: tiled over batch
            pl.BlockSpec((D, D), lambda i: (0, 0)),    # W: resident across grid
            pl.BlockSpec((2, D), lambda i: (0, 0)),    # [diag(W); b]: resident
        ],
        out_specs=pl.BlockSpec((TB, D), lambda i: (i, 0)),
        compiler_params=pltpu.CompilerParams(
            dimension_semantics=("parallel",)),
    )(xp, W, diag_b)

    return out[:B] if Bp != B else out


def init_params(key, input_size, dtype=jnp.float32):
    """Deterministic re-implementation of FeatureRegression.reset_parameters."""
    stdv = 1.0 / math.sqrt(input_size)
    kw, kb = jax.random.split(key)
    W = jax.random.uniform(kw, (input_size, input_size), dtype,
                           minval=-stdv, maxval=stdv)
    b = jax.random.uniform(kb, (input_size,), dtype, minval=-stdv, maxval=stdv)
    return W, b


if __name__ == "__main__":
    key = jax.random.PRNGKey(0)
    batch, input_size = 8, 32

    k_x, k_p = jax.random.split(key)
    x = jax.random.normal(k_x, (batch, input_size), jnp.float32)
    W, b = init_params(k_p, input_size)

    # Reference: exact torch semantics  F.linear(x, W * m, b).
    m = jnp.ones((input_size, input_size), jnp.float32) - jnp.eye(
        input_size, dtype=jnp.float32)

    z_h = feature_regression(x, W, b)
    jax.block_until_ready(z_h)
    ref = x @ (W * m).T + b
    assert z_h.shape == ref.shape
    assert jnp.allclose(z_h, ref, atol=1e-5, rtol=1e-5), "mismatch vs reference"

    # Second case: non-multiple-of-tile batch exercising the grid + padding.
    k_x2 = jax.random.fold_in(key, 7)
    x2 = jax.random.normal(k_x2, (20, input_size), jnp.float32)
    z_h2 = feature_regression(x2, W, b, batch_tile=8)   # grid = 3, padded to 24
    jax.block_until_ready(z_h2)
    ref2 = x2 @ (W * m).T + b
    assert jnp.allclose(z_h2, ref2, atol=1e-5, rtol=1e-5), "grid path mismatch"

    print("KERNEL_OK")
</pallas_src>

<mosaic_0001>
module attributes {stable_mosaic.version = 11 : i64} {
  func.func @_feature_regression_kernel(%arg0: i32, %arg1: memref<8x32xf32, #tpu.memory_space<vmem>>, %arg2: memref<32x32xf32, #tpu.memory_space<vmem>>, %arg3: memref<2x32xf32, #tpu.memory_space<vmem>>, %arg4: memref<8x32xf32, #tpu.memory_space<vmem>>) attributes {dimension_semantics = [#tpu.dimension_semantics<parallel>], iteration_bounds = array<i64: 1>, scalar_prefetch = 0 : i64, scratch_operands = 0 : i64, tpu.core_type = #tpu.core_type<tc>, window_params = [{transform_indices = @transform_0, window_bounds = array<i64: 8, 32>}, {pipeline_mode = #tpu.pipeline_mode<synchronous>, transform_indices = @transform_1, window_bounds = array<i64: 32, 32>}, {pipeline_mode = #tpu.pipeline_mode<synchronous>, transform_indices = @transform_2, window_bounds = array<i64: 2, 32>}, {transform_indices = @transform_3, window_bounds = array<i64: 8, 32>}]} {
    %c0 = arith.constant 0 : index
    %c0_0 = arith.constant 0 : index
    %0 = vector.load %arg1[%c0, %c0_0] : memref<8x32xf32, #tpu.memory_space<vmem>>, vector<8x32xf32>
    %c0_1 = arith.constant 0 : index
    %c0_2 = arith.constant 0 : index
    %1 = vector.load %arg2[%c0_1, %c0_2] : memref<32x32xf32, #tpu.memory_space<vmem>>, vector<32x32xf32>
    %cst = arith.constant dense<0.000000e+00> : vector<8x32xf32>
    %2 = tpu.matmul %0, %1, %cst {dimension_numbers = #tpu.dot_dimension_numbers<[1], [1], [0], [0], [0, 0, 1, 0], [], []>} : vector<8x32xf32>, vector<32x32xf32>, vector<8x32xf32> -> vector<8x32xf32>
    %c0_3 = arith.constant 0 : index
    %c0_4 = arith.constant 0 : index
    %3 = vector.load %arg3[%c0_3, %c0_4] : memref<2x32xf32, #tpu.memory_space<vmem>>, vector<1x32xf32>
    %c1 = arith.constant 1 : index
    %c0_5 = arith.constant 0 : index
    %4 = vector.load %arg3[%c1, %c0_5] : memref<2x32xf32, #tpu.memory_space<vmem>>, vector<1x32xf32>
    %5 = vector.broadcast %3 : vector<1x32xf32> to vector<8x32xf32>
    %6 = arith.mulf %0, %5 : vector<8x32xf32>
    %7 = arith.subf %2, %6 : vector<8x32xf32>
    %8 = vector.broadcast %4 : vector<1x32xf32> to vector<8x32xf32>
    %9 = arith.addf %7, %8 : vector<8x32xf32>
    %c0_6 = arith.constant 0 : index
    %c0_7 = arith.constant 0 : index
    %10 = vector.load %arg4[%c0_6, %c0_7] : memref<8x32xf32, #tpu.memory_space<vmem>>, vector<8x32xf32>
    tpu.vector_store %arg4[%c0_6, %c0_7], %9 {strides = array<i32>} : memref<8x32xf32, #tpu.memory_space<vmem>>, vector<8x32xf32>,
    return
  }
  func.func @transform_0(%arg0: i32) -> (i32, i32) {
    %c0_i32 = arith.constant 0 : i32
    %c0_i32_0 = arith.constant 0 : i32
    return %arg0, %c0_i32 : i32, i32
  }
  func.func @transform_1(%arg0: i32) -> (i32, i32) {
    %c0_i32 = arith.constant 0 : i32
    %c0_i32_0 = arith.constant 0 : i32
    %c0_i32_1 = arith.constant 0 : i32
    return %c0_i32, %c0_i32_0 : i32, i32
  }
  func.func @transform_2(%arg0: i32) -> (i32, i32) {
    %c0_i32 = arith.constant 0 : i32
    %c0_i32_0 = arith.constant 0 : i32
    %c0_i32_1 = arith.constant 0 : i32
    return %c0_i32, %c0_i32_0 : i32, i32
  }
  func.func @transform_3(%arg0: i32) -> (i32, i32) {
    %c0_i32 = arith.constant 0 : i32
    %c0_i32_0 = arith.constant 0 : i32
    return %arg0, %c0_i32 : i32, i32
  }
}

</mosaic_0001>

<bundles_post_ra>
// kernel: tpu_custom_call.1
= control target key start
LH: loop header
LB: loop body
LE: loop exit
PB: predicated region body
PF: predicated region fallthrough
CT: control target
= control target key end

     0   :  { %8 = vsyncpa [#allocation3], 0  ;;  %s354_s0 = inlined_call_operand.hbm [shape: f32[8,32], index: 0, kind: input, shape index: {}]   ;;  %s355_s1 = inlined_call_operand.hbm [shape: f32[32,32], index: 1, kind: input, shape index: {}]   ;;  %s356_s2 = inlined_call_operand.vmem [shape: f32[2,32], index: 2, kind: input, shape index: {}]   ;;  %s357_s3 = inlined_call_operand.hbm [shape: f32[8,32], index: 3, kind: output, shape index: {}]  }
   0x1   :  { %9 = vsyncpa [#allocation6], 0 }
   0x2   :  { %10 = vsyncpa [#allocation4], 0  ;;  %s273_s12 = smov [#allocation2]   ;;  %s274_s14 = smov [#allocation5]  }
   0x3   :  { %s17_s13 = sshll.u32 %s273_s12, 4  ;;  %s26_s15 = sshll.u32 %s274_s14, 4  ;;  %s18_s13 = int_to_ptr.vmem [resolvable:$true] %s17_s13  ;;  %s301_s15 = int_to_ptr.vmem [resolvable:$true] %s26_s15 }
   0x4   :  { %s201_s18 = scalar_lea.hbm %s354_s0, 128 }
   0x5   :  { %p202_p0 = scmp.ne.s32.totalorder %s354_s0, %s201_s18  ;;  %p205_p1 = scmp.lt.u32.totalorder %s201_s18, %s354_s0 }
   0x7   :  { %p207_p2 = pnand %p205_p1, %p202_p0 }
   0x9   :  { %210 = shalt.err (!%p207_p2)
}
   0xa   :  { %s211_s23 = scalar_lea.vmem %s18_s13, 128  ;;  %p216_p4 = scmp.lt.s32.totalorder %s18_s13, %s18_s13 }
   0xb   :  { %p212_p3 = scmp.ne.s32.totalorder %s18_s13, %s211_s23  ;;  %p217_p5 = scmp.lt.s32.totalorder %s211_s23, %s211_s23 }
   0xd   :  { %p218_p6 = por %p217_p5, %p216_p4 }
   0xf   :  { %p219_p7 = pnand %p218_p6, %p212_p3 }
  0x11   :  { %222 = shalt.err (!%p219_p7)
}
  0x12   :  { %20 = dma.hbm_to_vmem [thread:$0]  %s354_s0, 128, %s18_s13, [#allocation3]  }
  0x13   :  { %s223_s28 = scalar_lea.hbm %s355_s1, 512 }
  0x14   :  { %p224_p8 = scmp.ne.s32.totalorder %s355_s1, %s223_s28  ;;  %p227_p9 = scmp.lt.u32.totalorder %s223_s28, %s355_s1 }
  0x16   :  { %p229_p10 = pnand %p227_p9, %p224_p8 }
  0x18   :  { %232 = shalt.err (!%p229_p10)
}
  0x19   :  { %s233_s6 = scalar_lea.vmem %s301_s15, 512  ;;  %p238_p12 = scmp.lt.s32.totalorder %s301_s15, %s301_s15 }
  0x1a   :  { %p234_p11 = scmp.ne.s32.totalorder %s301_s15, %s233_s6  ;;  %p239_p13 = scmp.lt.s32.totalorder %s233_s6, %s233_s6 }
  0x1c   :  { %p240_p0 = por %p239_p13, %p238_p12 }
  0x1e   :  { %p241_p1 = pnand %p240_p0, %p234_p11 }
  0x20   :  { %244 = shalt.err (!%p241_p1)
}
  0x21   :  { %s275_s0 = smov 128   ;;  %s276_s7 = smov 8  }
  0x22   :  { %32 = dma.hbm_to_vmem [thread:$0]  %s355_s1, 512, %s301_s15, [#allocation6], %s275_s0, %s275_s0, %s276_s7  }
  0x23   :  { %267 = dma.done.wait [#allocation3], 128  }
  0x24   :  { %268 = vsyncadd [#allocation3], 4294967168 }
  0x25   :  { %269 = dma.done.wait [#allocation6], 512  }
  0x26   :  { %270 = vsyncadd [#allocation6], 4294966784  ;;  %v277_v0 = vmov 0.0|0.0   ;;  %vm278_vm0 = vmmov 0   ;;  %v279_v1 = vmov 0.0   ;;  %vm46_vm1 = vcmask 261120  }
  0x27   :  { %185 = vmatprep.subr.bf16.mxu0 %v277_v0  ;;  %182 = vmatprep.mubr.msk.f32.mxu0 %vm278_vm0, %v279_v1  ;;  %v42_v2 = vld [vmem:[#allocation5] sm:$0xff]  ;;  %v43_v3 = vld [vmem:[#allocation5 + $0x8] sm:$0xff]  ;;  %vm187_vm2 = vmpackc.low %vm46_vm1, %vm46_vm1  ;;  %s280_s13 = smov [#allocation7]  }
  0x28   :  { %v186_v4 = vpack.c.bf16 %v43_v3, %v42_v2  ;;  %v44_v5 = vld [vmem:[#allocation5 + $0x10] sm:$0xff]  ;;  %v45_v6 = vld [vmem:[#allocation5 + $0x18] sm:$0xff]  ;;  %s152_s14 = sshll.u32 %s280_s13, 4  ;;  %s153_s14 = int_to_ptr.vmem [resolvable:$true] %s152_s14 }
  0x29   :  { %v190_v7 = vpack.c.bf16 %v45_v6, %v44_v5  ;;  %v41_v8 = vld [vmem:[#allocation2] sm:$0xff]  ;;  %s245_s15 = scalar_lea.vmem %s153_s14, 128  ;;  %p250_p3 = scmp.lt.s32.totalorder %s153_s14, %s153_s14 }
  0x2a   :  { %188 = vmatpush3.bf16.xpose.msk.msra.mxu0 %vm187_vm2, %v186_v4  ;;  %v167_v9 = vld [vmem:[%s356_s2] ss:$0 sm:$0xff]  ;;  %v168_v12 = vld [vmem:[%s356_s2 + $0x1] ss:$0 sm:$0xff]  ;;  %p246_p2 = scmp.ne.s32.totalorder %s153_s14, %s245_s15  ;;  %p251_p4 = scmp.lt.s32.totalorder %s245_s15, %s245_s15 }
  0x2b   :  { %189 = vmatprep.subr.bf16.mxu0 %v277_v0  ;;  %v138_v10 = vmul.f32 %v167_v9, %v41_v8 }
  0x2c   :  { %p252_p5 = por %p251_p4, %p250_p3 }
  0x2e   :  { %p253_p6 = pnand %p252_p5, %p246_p2 }
  0x32   :  { %192 = vmatpush3.bf16.xpose.msk.msra.mxu0 %vm187_vm2, %v190_v7 }
  0x39   :  { %183 = vmatmul.mubr.msk.f32.vlgmr.msra.gmra.mrb[0].mxu0 %vm46_vm1, %v41_v8 }
 0x10c   :  { %v128_v11 = vpop.f32.mrb[0].mxu0 }
 0x10d   :  { %v139_v13 = vsub.f32 %v128_v11, %v138_v10  ;;  %v184_v14 = vpop.f32.mrb[1].mxu0 }
 0x10f   :  { %v144_v15 = vadd.f32 %v168_v12, %v139_v13 }
 0x111   :  { %145 = vst.msk [vmem:[#allocation7] sm:$0xff] %vm46_vm1, %v144_v15 }
 0x112   :  { %256 = shalt.err (!%p253_p6)
}
 0x113   :  { %s257_s18 = scalar_lea.hbm %s357_s3, 128 }
 0x114   :  { %p258_p7 = scmp.ne.s32.totalorder %s357_s3, %s257_s18  ;;  %p261_p8 = scmp.lt.u32.totalorder %s257_s18, %s357_s3 }
 0x116   :  { %p263_p9 = pnand %p261_p8, %p258_p7 }
 0x118   :  { %266 = shalt.err (!%p263_p9)
}
 0x119   :  { %155 = dma.vmem_to_hbm [thread:$0]  %s153_s14, 128, %s357_s3, [#allocation4]  }
 0x11a   :  { %271 = dma.done.wait [#allocation4], 128  }
 0x11b   :  { %272 = vsyncadd [#allocation4], 4294967168 }
 0x11c   :  { %159 = vsyncpa [#allocation3], 1 }
 0x11d   :  { %160 = vsyncpa [#allocation6], 1 }
 0x11e   :  { %161 = vsyncpa [#allocation4], 1 }

</bundles_post_ra>
